<compile_context>
chip_gen: v7x
topology: tpu7x:2x2x1
jax: 0.10.0
libtpu: 0.0.40
codegen_flags: <defaults>
</compile_context>

<pallas_src>
import functools

import jax
import jax.numpy as jnp
from jax.experimental import pallas as pl
from jax.experimental.pallas import tpu as pltpu

# ----------------------------------------------------------------------------
# Search-space config (mirrors models_search/controller.py globals)
# ----------------------------------------------------------------------------
NORM_TYPE = [None, "bn", "in"]
UP_TYPE = ["bilinear", "nearest", "deconv"]
ATTENTION_TYPE = [True, False]
TOKENS = [len(NORM_TYPE), len(UP_TYPE), len(ATTENTION_TYPE)]   # [3, 3, 2]
NUM_EMBED = sum(TOKENS)                                        # 8
N_LSTM = 3                                                     # lstm1 / lstm2 / lstm3
T_PAD = 128            # lane-dense decoder width; valid columns sliced on the host
HID_SIZE = 32


def _lstm_id(index):
    """Mirror the original forward(): lstm1 for 0<=i<3, lstm2 for 3<=i<7, lstm3 else."""
    if 0 <= index < 3:
        return 0
    if 3 <= index < 7:
        return 1
    return 2


# ----------------------------------------------------------------------------
# Fused Pallas kernel: [embedding lookup] -> LSTMCell -> decoder, per grid step
# ----------------------------------------------------------------------------
def _controller_kernel(embed_rows_ref, meta_ref,            # scalar prefetch (SMEM)
                       x0_ref, h0_ref, c0_ref, enc_ref,     # inputs (VMEM)
                       w_lstm_ref, b_lstm_ref, w_dec_ref, b_dec_ref,
                       logits_ref, hx_ref, cx_ref,          # outputs
                       xh_sc, c_sc,                         # VMEM scratch (carry)
                       *, batch, hid):
    s = pl.program_id(0)
    B, H = batch, hid

    # Initialise the recurrent carry from (h0, c0) on the first grid step.
    @pl.when(s == 0)
    def _init_carry():
        xh_sc[:, H:2 * H] = h0_ref[...]
        c_sc[...] = c0_ref[...]

    # ---- input: passthrough x0 or in-kernel embedding row gather -----------
    use_embed = meta_ref[s, 2]

    @pl.when(use_embed == 0)
    def _passthrough():
        xh_sc[:, 0:H] = x0_ref[...]

    @pl.when(use_embed == 1)
    def _embed_lookup():
        for b in range(B):                       # tiny static loop over batch rows
            row = embed_rows_ref[s, b]           # SMEM scalar (already offset)
            xh_sc[b:b + 1, 0:H] = enc_ref[pl.ds(row, 1), :]

    # ---- LSTM cell: single fused [B, 2H] @ [2H, 4H] matmul ------------------
    gates = (jnp.dot(xh_sc[...], w_lstm_ref[...],
                     preferred_element_type=jnp.float32)
             + b_lstm_ref[...])                  # [B, 4H], PyTorch order i,f,g,o
    i_g = jax.nn.sigmoid(gates[:, 0 * H:1 * H])
    f_g = jax.nn.sigmoid(gates[:, 1 * H:2 * H])
    g_g = jnp.tanh(gates[:, 2 * H:3 * H])
    o_g = jax.nn.sigmoid(gates[:, 3 * H:4 * H])

    cx = f_g * c_sc[...] + i_g * g_g
    hx = o_g * jnp.tanh(cx)

    # carry for the next grid step
    c_sc[...] = cx
    xh_sc[:, H:2 * H] = hx

    # ---- decoder: lane-dense padded logits ----------------------------------
    logits_ref[...] = (jnp.dot(hx, w_dec_ref[...],
                               preferred_element_type=jnp.float32)
                       + b_dec_ref[...])
    hx_ref[...] = hx
    cx_ref[...] = cx


def _build_controller_call(n_steps, batch, hid, t_pad, num_embed):
    """One pallas_call covering n_steps decode steps (n_steps=1 == original forward)."""
    B, H = batch, hid
    kernel = functools.partial(_controller_kernel, batch=B, hid=H)
    grid_spec = pltpu.PrefetchScalarGridSpec(
        num_scalar_prefetch=2,          # embed_rows [n_steps, B], meta [n_steps, 3]
        grid=(n_steps,),
        in_specs=[
            pl.BlockSpec((B, H), lambda s, er, mt: (0, 0)),                 # x0
            pl.BlockSpec((B, H), lambda s, er, mt: (0, 0)),                 # h0
            pl.BlockSpec((B, H), lambda s, er, mt: (0, 0)),                 # c0
            pl.BlockSpec((num_embed, H), lambda s, er, mt: (0, 0)),         # encoder
            pl.BlockSpec((None, 2 * H, 4 * H),
                         lambda s, er, mt: (mt[s, 1], 0, 0)),               # stacked LSTM W
            pl.BlockSpec((None, 1, 4 * H),
                         lambda s, er, mt: (mt[s, 1], 0, 0)),               # stacked LSTM b
            pl.BlockSpec((None, H, t_pad),
                         lambda s, er, mt: (mt[s, 0], 0, 0)),               # stacked dec W
            pl.BlockSpec((None, 1, t_pad),
                         lambda s, er, mt: (mt[s, 0], 0, 0)),               # stacked dec b
        ],
        out_specs=[
            pl.BlockSpec((None, B, t_pad), lambda s, er, mt: (s, 0, 0)),    # logits per step
            pl.BlockSpec((B, H), lambda s, er, mt: (0, 0)),                 # final hx
            pl.BlockSpec((B, H), lambda s, er, mt: (0, 0)),                 # final cx
        ],
        scratch_shapes=[
            pltpu.VMEM((B, 2 * H), jnp.float32),    # [embed | h] carry
            pltpu.VMEM((B, H), jnp.float32),        # c carry
        ],
    )
    return pl.pallas_call(
        kernel,
        grid_spec=grid_spec,
        out_shape=(
            jax.ShapeDtypeStruct((n_steps, B, t_pad), jnp.float32),
            jax.ShapeDtypeStruct((B, H), jnp.float32),
            jax.ShapeDtypeStruct((B, H), jnp.float32),
        ),
        compiler_params=pltpu.CompilerParams(
            dimension_semantics=("arbitrary",)),    # h/c carry -> sequential grid
    )


# ----------------------------------------------------------------------------
# Module: parameter setup + forward / fused unroll
# ----------------------------------------------------------------------------
class Controller3Pallas:
    def __init__(self, hid_size=HID_SIZE, seed=0):
        self.hid_size = H = hid_size
        self.tokens = list(TOKENS)
        self.n_dec = len(self.tokens)
        self.num_embed = NUM_EMBED
        self.t_pad = T_PAD
        self._calls = {}                       # (n_steps, batch) -> jitted pallas_call

        key = jax.random.PRNGKey(seed)
        ks = iter(jax.random.split(key, 1 + 4 * N_LSTM + 2 * self.n_dec))
        scale = 1.0 / (H ** 0.5)

        # nn.Embedding(sum(tokens), H)
        self.encoder = jax.random.normal(next(ks), (self.num_embed, H), jnp.float32)

        # lstm1..lstm3, fused input/hidden weights: [embed|h] @ [2H, 4H] + b
        w_lstm, b_lstm = [], []
        for _ in range(N_LSTM):
            w_ih = jax.random.uniform(next(ks), (4 * H, H), jnp.float32, -scale, scale)
            w_hh = jax.random.uniform(next(ks), (4 * H, H), jnp.float32, -scale, scale)
            b_ih = jax.random.uniform(next(ks), (4 * H,), jnp.float32, -scale, scale)
            b_hh = jax.random.uniform(next(ks), (4 * H,), jnp.float32, -scale, scale)
            w_lstm.append(jnp.concatenate([w_ih.T, w_hh.T], axis=0))   # [2H, 4H]
            b_lstm.append((b_ih + b_hh).reshape(1, 4 * H))             # [1, 4H]
        self.w_lstm_all = jnp.stack(w_lstm)                            # [3, 2H, 4H]
        self.b_lstm_all = jnp.stack(b_lstm)                            # [3, 1, 4H]

        # decoders, stacked + zero-padded to one lane-dense width
        w_dec, b_dec = [], []
        for tok in self.tokens:
            w = jax.random.uniform(next(ks), (tok, H), jnp.float32, -scale, scale)
            b = jax.random.uniform(next(ks), (tok,), jnp.float32, -scale, scale)
            w_dec.append(jnp.zeros((H, self.t_pad), jnp.float32).at[:, :tok].set(w.T))
            b_dec.append(jnp.zeros((1, self.t_pad), jnp.float32).at[0, :tok].set(b))
        self.w_dec_all = jnp.stack(w_dec)                              # [n_dec, H, T_PAD]
        self.b_dec_all = jnp.stack(b_dec)                              # [n_dec, 1, T_PAD]

    # -- helpers ---------------------------------------------------------------
    def _get_call(self, n_steps, batch):
        key = (n_steps, batch)
        if key not in self._calls:
            self._calls[key] = jax.jit(_build_controller_call(
                n_steps, batch, self.hid_size, self.t_pad, self.num_embed))
        return self._calls[key]

    def init_hidden(self, batch_size):
        return jnp.zeros((batch_size, self.hid_size), jnp.float32)

    def split_logits(self, logits_padded):
        """Slice the lane-dense [n_steps, B, T_PAD] logits back to valid widths."""
        return [logits_padded[i, :, :tok] for i, tok in enumerate(self.tokens)]

    # -- original per-index forward (single-step, one compiled kernel) ---------
    def forward(self, x, hidden, index):
        h, c = hidden
        B = h.shape[0]
        if index == 0:
            x0 = x.astype(jnp.float32)                       # [B, H] passthrough
            embed_rows = jnp.zeros((1, B), jnp.int32)        # unused
            use_embed = 0
        else:
            x0 = jnp.zeros((B, self.hid_size), jnp.float32)  # unused
            embed_rows = x.astype(jnp.int32).reshape(1, B)   # caller supplies offset rows
            use_embed = 1
        meta = jnp.array([[index, _lstm_id(index), use_embed]], jnp.int32)
        call = self._get_call(1, B)
        logits, hx, cx = call(embed_rows, meta, x0, h, c,
                              self.encoder, self.w_lstm_all, self.b_lstm_all,
                              self.w_dec_all, self.b_dec_all)
        logit = logits[0, :, :self.tokens[index]]
        return logit, (hx, cx)

    # -- fused full unroll (all decode steps in ONE pallas_call) ---------------
    # TODO(synk): true autoregressive sampling (multinomial inside the kernel) would
    # need in-kernel categorical RNG; actions are supplied by the caller instead.
    def unrolled_forward(self, x0, hidden, actions):
        """actions: int32 [n_steps, B]; actions[i] feeds step i+1's embedding
        (offset by sum(tokens[:i]) exactly as in Controller3.sample)."""
        n = self.n_dec
        B = x0.shape[0]
        h, c = hidden
        rows = [jnp.zeros((B,), jnp.int32)]                  # step 0: passthrough
        for i in range(1, n):
            rows.append(actions[i - 1].astype(jnp.int32) + sum(self.tokens[:i - 1]))
        embed_rows = jnp.stack(rows)                         # [n, B]
        meta = jnp.array([[i, _lstm_id(i), 0 if i == 0 else 1] for i in range(n)],
                         jnp.int32)                          # [n, 3]
        call = self._get_call(n, B)
        logits, hx, cx = call(embed_rows, meta, x0.astype(jnp.float32), h, c,
                              self.encoder, self.w_lstm_all, self.b_lstm_all,
                              self.w_dec_all, self.b_dec_all)
        return logits, (hx, cx)


# ----------------------------------------------------------------------------
# Pure-JAX reference (same math, plain XLA) for correctness checks
# ----------------------------------------------------------------------------
def _ref_forward(ctrl, x, h, c, index):
    H = ctrl.hid_size
    lid = _lstm_id(index)
    embed = x if index == 0 else jnp.take(ctrl.encoder, x, axis=0)
    gates = jnp.concatenate([embed, h], axis=1) @ ctrl.w_lstm_all[lid] + ctrl.b_lstm_all[lid]
    i = jax.nn.sigmoid(gates[:, 0 * H:1 * H])
    f = jax.nn.sigmoid(gates[:, 1 * H:2 * H])
    g = jnp.tanh(gates[:, 2 * H:3 * H])
    o = jax.nn.sigmoid(gates[:, 3 * H:4 * H])
    cx = f * c + i * g
    hx = o * jnp.tanh(cx)
    tok = ctrl.tokens[index]
    logit = hx @ ctrl.w_dec_all[index, :, :tok] + ctrl.b_dec_all[index, 0, :tok]
    return logit, hx, cx


if __name__ == "__main__":
    B = 2
    ctrl = Controller3Pallas(hid_size=HID_SIZE, seed=0)
    n_steps = len(ctrl.tokens)

    key = jax.random.PRNGKey(0)
    kx, ka = jax.random.split(key)
    x0 = jax.random.normal(kx, (B, HID_SIZE), jnp.float32)
    h0 = ctrl.init_hidden(B)
    c0 = ctrl.init_hidden(B)

    # deterministic "sampled" actions per step (teacher forcing)
    act_keys = jax.random.split(ka, n_steps)
    actions = jnp.stack([jax.random.randint(act_keys[i], (B,), 0, ctrl.tokens[i])
                         for i in range(n_steps)]).astype(jnp.int32)   # [n_steps, B]

    # ---- per-index forward (original module API), one compiled kernel -------
    hidden = (h0, c0)
    step_logits = []
    x = x0
    for i in range(n_steps):
        logit, hidden = ctrl.forward(x, hidden, i)
        step_logits.append(logit)
        # next-step embedding token, Controller3.sample() convention
        x = actions[i] + sum(ctrl.tokens[:i])
    jax.block_until_ready(step_logits[-1])

    # ---- fused full unroll: ONE pallas_call for all steps --------------------
    fused_logits, fused_hidden = ctrl.unrolled_forward(x0, (h0, c0), actions)
    jax.block_until_ready(fused_logits)
    fused_per_step = ctrl.split_logits(fused_logits)

    # ---- check against the pure-JAX reference --------------------------------
    h, c = h0, c0
    x = x0
    for i in range(n_steps):
        ref_logit, h, c = _ref_forward(ctrl, x, h, c, i)
        assert jnp.allclose(step_logits[i], ref_logit, atol=2e-5, rtol=1e-5), \
            f"per-step logit mismatch at step {i}"
        assert jnp.allclose(fused_per_step[i], ref_logit, atol=2e-5, rtol=1e-5), \
            f"fused logit mismatch at step {i}"
        # padded columns of the fused output must be exactly zero
        assert jnp.allclose(fused_logits[i, :, ctrl.tokens[i]:], 0.0), "padding not zero"
        x = actions[i] + sum(ctrl.tokens[:i])
    assert jnp.allclose(fused_hidden[0], h, atol=2e-5, rtol=1e-5), "fused hx mismatch"
    assert jnp.allclose(fused_hidden[1], c, atol=2e-5, rtol=1e-5), "fused cx mismatch"
    assert jnp.allclose(hidden[0], h, atol=2e-5, rtol=1e-5), "per-step hx mismatch"
    assert jnp.allclose(hidden[1], c, atol=2e-5, rtol=1e-5), "per-step cx mismatch"

    print("KERNEL_OK")
</pallas_src>

<mosaic_0001>
module attributes {stable_mosaic.version = 11 : i64} {
  func.func @_controller_kernel(%arg0: i32, %arg1: memref<1x2xi32, #tpu.memory_space<smem>>, %arg2: memref<1x3xi32, #tpu.memory_space<smem>>, %arg3: memref<2x32xf32, #tpu.memory_space<vmem>>, %arg4: memref<2x32xf32, #tpu.memory_space<vmem>>, %arg5: memref<2x32xf32, #tpu.memory_space<vmem>>, %arg6: memref<8x32xf32, #tpu.memory_space<vmem>>, %arg7: memref<1x64x128xf32, #tpu.memory_space<vmem>>, %arg8: memref<1x1x128xf32, #tpu.memory_space<vmem>>, %arg9: memref<1x32x128xf32, #tpu.memory_space<vmem>>, %arg10: memref<1x1x128xf32, #tpu.memory_space<vmem>>, %arg11: memref<1x2x128xf32, #tpu.memory_space<vmem>>, %arg12: memref<2x32xf32, #tpu.memory_space<vmem>>, %arg13: memref<2x32xf32, #tpu.memory_space<vmem>>, %arg14: memref<2x64xf32, #tpu.memory_space<vmem>>, %arg15: memref<2x32xf32, #tpu.memory_space<vmem>>) attributes {dimension_semantics = [#tpu.dimension_semantics<arbitrary>], iteration_bounds = array<i64: 1>, scalar_prefetch = 2 : i64, scratch_operands = 2 : i64, tpu.core_type = #tpu.core_type<tc>, window_params = [{pipeline_mode = #tpu.pipeline_mode<synchronous>, transform_indices = @transform_0, window_bounds = array<i64: 2, 32>}, {pipeline_mode = #tpu.pipeline_mode<synchronous>, transform_indices = @transform_1, window_bounds = array<i64: 2, 32>}, {pipeline_mode = #tpu.pipeline_mode<synchronous>, transform_indices = @transform_2, window_bounds = array<i64: 2, 32>}, {pipeline_mode = #tpu.pipeline_mode<synchronous>, transform_indices = @transform_3, window_bounds = array<i64: 8, 32>}, {transform_indices = @transform_4, window_bounds = array<i64: 1, 64, 128>}, {transform_indices = @transform_5, window_bounds = array<i64: 1, 1, 128>}, {transform_indices = @transform_6, window_bounds = array<i64: 1, 32, 128>}, {transform_indices = @transform_7, window_bounds = array<i64: 1, 1, 128>}, {transform_indices = @transform_8, window_bounds = array<i64: 1, 2, 128>}, {pipeline_mode = #tpu.pipeline_mode<synchronous>, transform_indices = @transform_9, window_bounds = array<i64: 2, 32>}, {pipeline_mode = #tpu.pipeline_mode<synchronous>, transform_indices = @transform_10, window_bounds = array<i64: 2, 32>}]} {
    %c0_i32 = arith.constant 0 : i32
    %0 = arith.cmpi eq, %arg0, %c0_i32 : i32
    %1 = arith.extui %0 : i1 to i32
    %c0_i32_0 = arith.constant 0 : i32
    %2 = arith.cmpi ne, %1, %c0_i32_0 : i32
    scf.if %2 {
      %c0_33 = arith.constant 0 : index
      %c0_34 = arith.constant 0 : index
      %59 = vector.load %arg4[%c0_33, %c0_34] : memref<2x32xf32, #tpu.memory_space<vmem>>, vector<2x32xf32>
      %c0_35 = arith.constant 0 : index
      %c32_36 = arith.constant 32 : index
      %60 = vector.load %arg14[%c0_35, %c32_36] : memref<2x64xf32, #tpu.memory_space<vmem>>, vector<2x32xf32>
      tpu.vector_store %arg14[%c0_35, %c32_36], %59 {strides = array<i32>} : memref<2x64xf32, #tpu.memory_space<vmem>>, vector<2x32xf32>,
      %c0_37 = arith.constant 0 : index
      %c0_38 = arith.constant 0 : index
      %61 = vector.load %arg5[%c0_37, %c0_38] : memref<2x32xf32, #tpu.memory_space<vmem>>, vector<2x32xf32>
      %c0_39 = arith.constant 0 : index
      %c0_40 = arith.constant 0 : index
      %62 = vector.load %arg15[%c0_39, %c0_40] : memref<2x32xf32, #tpu.memory_space<vmem>>, vector<2x32xf32>
      tpu.vector_store %arg15[%c0_39, %c0_40], %61 {strides = array<i32>} : memref<2x32xf32, #tpu.memory_space<vmem>>, vector<2x32xf32>,
    } else {
    }
    %3 = arith.index_cast %arg0 : i32 to index
    %c2 = arith.constant 2 : index
    %4 = memref.load %arg2[%3, %c2] : memref<1x3xi32, #tpu.memory_space<smem>>
    %c0_i32_1 = arith.constant 0 : i32
    %5 = arith.cmpi eq, %4, %c0_i32_1 : i32
    %6 = arith.extui %5 : i1 to i32
    %c0_i32_2 = arith.constant 0 : i32
    %7 = arith.cmpi ne, %6, %c0_i32_2 : i32
    scf.if %7 {
      %c0_33 = arith.constant 0 : index
      %c0_34 = arith.constant 0 : index
      %59 = vector.load %arg3[%c0_33, %c0_34] : memref<2x32xf32, #tpu.memory_space<vmem>>, vector<2x32xf32>
      %c0_35 = arith.constant 0 : index
      %c0_36 = arith.constant 0 : index
      %60 = vector.load %arg14[%c0_35, %c0_36] : memref<2x64xf32, #tpu.memory_space<vmem>>, vector<2x32xf32>
      tpu.vector_store %arg14[%c0_35, %c0_36], %59 {strides = array<i32>} : memref<2x64xf32, #tpu.memory_space<vmem>>, vector<2x32xf32>,
    } else {
    }
    %c1_i32 = arith.constant 1 : i32
    %8 = arith.cmpi eq, %4, %c1_i32 : i32
    %9 = arith.extui %8 : i1 to i32
    %c0_i32_3 = arith.constant 0 : i32
    %10 = arith.cmpi ne, %9, %c0_i32_3 : i32
    scf.if %10 {
      %59 = arith.index_cast %arg0 : i32 to index
      %c0_33 = arith.constant 0 : index
      %60 = memref.load %arg1[%59, %c0_33] : memref<1x2xi32, #tpu.memory_space<smem>>
      %61 = arith.index_cast %60 : i32 to index
      %c0_34 = arith.constant 0 : index
      %62 = vector.load %arg6[%61, %c0_34] : memref<8x32xf32, #tpu.memory_space<vmem>>, vector<1x32xf32>
      %c0_35 = arith.constant 0 : index
      %c0_36 = arith.constant 0 : index
      %63 = vector.load %arg14[%c0_35, %c0_36] : memref<2x64xf32, #tpu.memory_space<vmem>>, vector<1x32xf32>
      tpu.vector_store %arg14[%c0_35, %c0_36], %62 {strides = array<i32>} : memref<2x64xf32, #tpu.memory_space<vmem>>, vector<1x32xf32>,
      %64 = arith.index_cast %arg0 : i32 to index
      %c1 = arith.constant 1 : index
      %65 = memref.load %arg1[%64, %c1] : memref<1x2xi32, #tpu.memory_space<smem>>
      %66 = arith.index_cast %65 : i32 to index
      %c0_37 = arith.constant 0 : index
      %67 = vector.load %arg6[%66, %c0_37] : memref<8x32xf32, #tpu.memory_space<vmem>>, vector<1x32xf32>
      %c1_38 = arith.constant 1 : index
      %c0_39 = arith.constant 0 : index
      %68 = vector.load %arg14[%c1_38, %c0_39] : memref<2x64xf32, #tpu.memory_space<vmem>>, vector<1x32xf32>
      tpu.vector_store %arg14[%c1_38, %c0_39], %67 {strides = array<i32>} : memref<2x64xf32, #tpu.memory_space<vmem>>, vector<1x32xf32>,
    } else {
    }
    %c0 = arith.constant 0 : index
    %c0_4 = arith.constant 0 : index
    %11 = vector.load %arg14[%c0, %c0_4] : memref<2x64xf32, #tpu.memory_space<vmem>>, vector<2x64xf32>
    %c0_5 = arith.constant 0 : index
    %c0_6 = arith.constant 0 : index
    %c0_7 = arith.constant 0 : index
    %12 = vector.load %arg7[%c0_5, %c0_6, %c0_7] : memref<1x64x128xf32, #tpu.memory_space<vmem>>, vector<1x64x128xf32>
    %13 = vector.shape_cast %12 : vector<1x64x128xf32> to vector<64x128xf32>
    %cst = arith.constant dense<0.000000e+00> : vector<2x128xf32>
    %14 = tpu.matmul %11, %13, %cst {dimension_numbers = #tpu.dot_dimension_numbers<[1], [0], [0], [1], [0, 0, 1, 1], [], []>} : vector<2x64xf32>, vector<64x128xf32>, vector<2x128xf32> -> vector<2x128xf32>
    %c0_8 = arith.constant 0 : index
    %c0_9 = arith.constant 0 : index
    %c0_10 = arith.constant 0 : index
    %15 = vector.load %arg8[%c0_8, %c0_9, %c0_10] : memref<1x1x128xf32, #tpu.memory_space<vmem>>, vector<1x1x128xf32>
    %16 = vector.shape_cast %15 : vector<1x1x128xf32> to vector<1x128xf32>
    %17 = vector.broadcast %16 : vector<1x128xf32> to vector<2x128xf32>
    %18 = arith.addf %14, %17 : vector<2x128xf32>
    %19 = vector.extract_strided_slice %18 {offsets = [0, 0], sizes = [2, 32], strides = [1, 1]} : vector<2x128xf32> to vector<2x32xf32>
    %20 = arith.negf %19 : vector<2x32xf32>
    %21 = math.exp %20 : vector<2x32xf32>
    %cst_11 = arith.constant 1.000000e+00 : f32
    %22 = vector.broadcast %cst_11 : f32 to vector<2x32xf32>
    %23 = arith.addf %22, %21 : vector<2x32xf32>
    %24 = arith.divf %22, %23 : vector<2x32xf32>
    %25 = vector.extract_strided_slice %18 {offsets = [0, 32], sizes = [2, 32], strides = [1, 1]} : vector<2x128xf32> to vector<2x32xf32>
    %26 = arith.negf %25 : vector<2x32xf32>
    %27 = math.exp %26 : vector<2x32xf32>
    %cst_12 = arith.constant 1.000000e+00 : f32
    %28 = vector.broadcast %cst_12 : f32 to vector<2x32xf32>
    %29 = arith.addf %28, %27 : vector<2x32xf32>
    %30 = arith.divf %28, %29 : vector<2x32xf32>
    %31 = vector.extract_strided_slice %18 {offsets = [0, 64], sizes = [2, 32], strides = [1, 1]} : vector<2x128xf32> to vector<2x32xf32>
    %32 = math.tanh %31 : vector<2x32xf32>
    %33 = vector.extract_strided_slice %18 {offsets = [0, 96], sizes = [2, 32], strides = [1, 1]} : vector<2x128xf32> to vector<2x32xf32>
    %34 = arith.negf %33 : vector<2x32xf32>
    %35 = math.exp %34 : vector<2x32xf32>
    %cst_13 = arith.constant 1.000000e+00 : f32
    %36 = vector.broadcast %cst_13 : f32 to vector<2x32xf32>
    %37 = arith.addf %36, %35 : vector<2x32xf32>
    %38 = arith.divf %36, %37 : vector<2x32xf32>
    %c0_14 = arith.constant 0 : index
    %c0_15 = arith.constant 0 : index
    %39 = vector.load %arg15[%c0_14, %c0_15] : memref<2x32xf32, #tpu.memory_space<vmem>>, vector<2x32xf32>
    %40 = arith.mulf %30, %39 : vector<2x32xf32>
    %41 = arith.mulf %24, %32 : vector<2x32xf32>
    %42 = arith.addf %40, %41 : vector<2x32xf32>
    %43 = math.tanh %42 : vector<2x32xf32>
    %44 = arith.mulf %38, %43 : vector<2x32xf32>
    %c0_16 = arith.constant 0 : index
    %c0_17 = arith.constant 0 : index
    %45 = vector.load %arg15[%c0_16, %c0_17] : memref<2x32xf32, #tpu.memory_space<vmem>>, vector<2x32xf32>
    tpu.vector_store %arg15[%c0_16, %c0_17], %42 {strides = array<i32>} : memref<2x32xf32, #tpu.memory_space<vmem>>, vector<2x32xf32>,
    %c0_18 = arith.constant 0 : index
    %c32 = arith.constant 32 : index
    %46 = vector.load %arg14[%c0_18, %c32] : memref<2x64xf32, #tpu.memory_space<vmem>>, vector<2x32xf32>
    tpu.vector_store %arg14[%c0_18, %c32], %44 {strides = array<i32>} : memref<2x64xf32, #tpu.memory_space<vmem>>, vector<2x32xf32>,
    %c0_19 = arith.constant 0 : index
    %c0_20 = arith.constant 0 : index
    %c0_21 = arith.constant 0 : index
    %47 = vector.load %arg9[%c0_19, %c0_20, %c0_21] : memref<1x32x128xf32, #tpu.memory_space<vmem>>, vector<1x32x128xf32>
    %48 = vector.shape_cast %47 : vector<1x32x128xf32> to vector<32x128xf32>
    %cst_22 = arith.constant dense<0.000000e+00> : vector<2x128xf32>
    %49 = tpu.matmul %44, %48, %cst_22 {dimension_numbers = #tpu.dot_dimension_numbers<[1], [0], [0], [1], [0, 0, 1, 1], [], []>} : vector<2x32xf32>, vector<32x128xf32>, vector<2x128xf32> -> vector<2x128xf32>
    %c0_23 = arith.constant 0 : index
    %c0_24 = arith.constant 0 : index
    %c0_25 = arith.constant 0 : index
    %50 = vector.load %arg10[%c0_23, %c0_24, %c0_25] : memref<1x1x128xf32, #tpu.memory_space<vmem>>, vector<1x1x128xf32>
    %51 = vector.shape_cast %50 : vector<1x1x128xf32> to vector<1x128xf32>
    %52 = vector.broadcast %51 : vector<1x128xf32> to vector<2x128xf32>
    %53 = arith.addf %49, %52 : vector<2x128xf32>
    %c0_26 = arith.constant 0 : index
    %c0_27 = arith.constant 0 : index
    %c0_28 = arith.constant 0 : index
    %54 = vector.load %arg11[%c0_26, %c0_27, %c0_28] : memref<1x2x128xf32, #tpu.memory_space<vmem>>, vector<1x2x128xf32>
    %55 = vector.shape_cast %54 : vector<1x2x128xf32> to vector<2x128xf32>
    %56 = vector.shape_cast %53 : vector<2x128xf32> to vector<1x2x128xf32>
    tpu.vector_store %arg11[%c0_26, %c0_27, %c0_28], %56 {strides = array<i32>} : memref<1x2x128xf32, #tpu.memory_space<vmem>>, vector<1x2x128xf32>,
    %c0_29 = arith.constant 0 : index
    %c0_30 = arith.constant 0 : index
    %57 = vector.load %arg12[%c0_29, %c0_30] : memref<2x32xf32, #tpu.memory_space<vmem>>, vector<2x32xf32>
    tpu.vector_store %arg12[%c0_29, %c0_30], %44 {strides = array<i32>} : memref<2x32xf32, #tpu.memory_space<vmem>>, vector<2x32xf32>,
    %c0_31 = arith.constant 0 : index
    %c0_32 = arith.constant 0 : index
    %58 = vector.load %arg13[%c0_31, %c0_32] : memref<2x32xf32, #tpu.memory_space<vmem>>, vector<2x32xf32>
    tpu.vector_store %arg13[%c0_31, %c0_32], %42 {strides = array<i32>} : memref<2x32xf32, #tpu.memory_space<vmem>>, vector<2x32xf32>,
    return
  }
  func.func @transform_0(%arg0: i32, %arg1: memref<1x2xi32, #tpu.memory_space<smem>>, %arg2: memref<1x3xi32, #tpu.memory_space<smem>>) -> (i32, i32) {
    %c0_i32 = arith.constant 0 : i32
    %c0_i32_0 = arith.constant 0 : i32
    %c0_i32_1 = arith.constant 0 : i32
    return %c0_i32, %c0_i32_0 : i32, i32
  }
  func.func @transform_1(%arg0: i32, %arg1: memref<1x2xi32, #tpu.memory_space<smem>>, %arg2: memref<1x3xi32, #tpu.memory_space<smem>>) -> (i32, i32) {
    %c0_i32 = arith.constant 0 : i32
    %c0_i32_0 = arith.constant 0 : i32
    %c0_i32_1 = arith.constant 0 : i32
    return %c0_i32, %c0_i32_0 : i32, i32
  }
  func.func @transform_2(%arg0: i32, %arg1: memref<1x2xi32, #tpu.memory_space<smem>>, %arg2: memref<1x3xi32, #tpu.memory_space<smem>>) -> (i32, i32) {
    %c0_i32 = arith.constant 0 : i32
    %c0_i32_0 = arith.constant 0 : i32
    %c0_i32_1 = arith.constant 0 : i32
    return %c0_i32, %c0_i32_0 : i32, i32
  }
  func.func @transform_3(%arg0: i32, %arg1: memref<1x2xi32, #tpu.memory_space<smem>>, %arg2: memref<1x3xi32, #tpu.memory_space<smem>>) -> (i32, i32) {
    %c0_i32 = arith.constant 0 : i32
    %c0_i32_0 = arith.constant 0 : i32
    %c0_i32_1 = arith.constant 0 : i32
    return %c0_i32, %c0_i32_0 : i32, i32
  }
  func.func @transform_4(%arg0: i32, %arg1: memref<1x2xi32, #tpu.memory_space<smem>>, %arg2: memref<1x3xi32, #tpu.memory_space<smem>>) -> (i32, i32, i32) {
    %0 = arith.index_cast %arg0 : i32 to index
    %c1 = arith.constant 1 : index
    %1 = memref.load %arg2[%0, %c1] : memref<1x3xi32, #tpu.memory_space<smem>>
    %c0_i32 = arith.constant 0 : i32
    %c0_i32_0 = arith.constant 0 : i32
    %c0_i32_1 = arith.constant 0 : i32
    return %1, %c0_i32, %c0_i32_0 : i32, i32, i32
  }
  func.func @transform_5(%arg0: i32, %arg1: memref<1x2xi32, #tpu.memory_space<smem>>, %arg2: memref<1x3xi32, #tpu.memory_space<smem>>) -> (i32, i32, i32) {
    %0 = arith.index_cast %arg0 : i32 to index
    %c1 = arith.constant 1 : index
    %1 = memref.load %arg2[%0, %c1] : memref<1x3xi32, #tpu.memory_space<smem>>
    %c0_i32 = arith.constant 0 : i32
    %c0_i32_0 = arith.constant 0 : i32
    %c0_i32_1 = arith.constant 0 : i32
    return %1, %c0_i32, %c0_i32_0 : i32, i32, i32
  }
  func.func @transform_6(%arg0: i32, %arg1: memref<1x2xi32, #tpu.memory_space<smem>>, %arg2: memref<1x3xi32, #tpu.memory_space<smem>>) -> (i32, i32, i32) {
    %0 = arith.index_cast %arg0 : i32 to index
    %c0 = arith.constant 0 : index
    %1 = memref.load %arg2[%0, %c0] : memref<1x3xi32, #tpu.memory_space<smem>>
    %c0_i32 = arith.constant 0 : i32
    %c0_i32_0 = arith.constant 0 : i32
    %c0_i32_1 = arith.constant 0 : i32
    return %1, %c0_i32, %c0_i32_0 : i32, i32, i32
  }
  func.func @transform_7(%arg0: i32, %arg1: memref<1x2xi32, #tpu.memory_space<smem>>, %arg2: memref<1x3xi32, #tpu.memory_space<smem>>) -> (i32, i32, i32) {
    %0 = arith.index_cast %arg0 : i32 to index
    %c0 = arith.constant 0 : index
    %1 = memref.load %arg2[%0, %c0] : memref<1x3xi32, #tpu.memory_space<smem>>
    %c0_i32 = arith.constant 0 : i32
    %c0_i32_0 = arith.constant 0 : i32
    %c0_i32_1 = arith.constant 0 : i32
    return %1, %c0_i32, %c0_i32_0 : i32, i32, i32
  }
  func.func @transform_8(%arg0: i32, %arg1: memref<1x2xi32, #tpu.memory_space<smem>>, %arg2: memref<1x3xi32, #tpu.memory_space<smem>>) -> (i32, i32, i32) {
    %c0_i32 = arith.constant 0 : i32
    %c0_i32_0 = arith.constant 0 : i32
    %c0_i32_1 = arith.constant 0 : i32
    return %arg0, %c0_i32, %c0_i32_0 : i32, i32, i32
  }
  func.func @transform_9(%arg0: i32, %arg1: memref<1x2xi32, #tpu.memory_space<smem>>, %arg2: memref<1x3xi32, #tpu.memory_space<smem>>) -> (i32, i32) {
    %c0_i32 = arith.constant 0 : i32
    %c0_i32_0 = arith.constant 0 : i32
    %c0_i32_1 = arith.constant 0 : i32
    return %c0_i32, %c0_i32_0 : i32, i32
  }
  func.func @transform_10(%arg0: i32, %arg1: memref<1x2xi32, #tpu.memory_space<smem>>, %arg2: memref<1x3xi32, #tpu.memory_space<smem>>) -> (i32, i32) {
    %c0_i32 = arith.constant 0 : i32
    %c0_i32_0 = arith.constant 0 : i32
    %c0_i32_1 = arith.constant 0 : i32
    return %c0_i32, %c0_i32_0 : i32, i32
  }
}

</mosaic_0001>

<bundles_post_ra>
// kernel: tpu_custom_call.1
= control target key start
LH: loop header
LB: loop body
LE: loop exit
PB: predicated region body
PF: predicated region fallthrough
CT: control target
= control target key end

     0   :  { %s1042_s0 = inlined_call_operand.hbm [shape: s32[1,2], index: 0, kind: input, shape index: {}]   ;;  %s1043_s2 = inlined_call_operand.hbm [shape: f32[2,32], index: 2, kind: input, shape index: {}]   ;;  %s1044_s3 = inlined_call_operand.hbm [shape: f32[2,32], index: 3, kind: input, shape index: {}]   ;;  %s1045_s4 = inlined_call_operand.hbm [shape: f32[2,32], index: 4, kind: input, shape index: {}]   ;;  %s1046_s5 = inlined_call_operand.vmem [shape: f32[8,32], index: 5, kind: input, shape index: {}]   ;;  %s1047_s6 = inlined_call_operand.hbm [shape: f32[3,64,128], index: 6, kind: input, shape index: {}]   ;;  %s1048_s7 = inlined_call_operand.vmem [shape: f32[3,1,128], index: 7, kind: input, shape index: {}]   ;;  %s1049_s8 = inlined_call_operand.hbm [shape: f32[3,32,128], index: 8, kind: input, shape index: {}]   ;;  %s1050_s9 = inlined_call_operand.vmem [shape: f32[3,1,128], index: 9, kind: input, shape index: {}]   ;;  %s1051_s10 = inlined_call_operand.hbm [shape: f32[1,2,128], index: 10, kind: output, shape index: {0}]   ;;  %s1052_s11 = inlined_call_operand.hbm [shape: f32[2,32], index: 11, kind: output, shape index: {1}]   ;;  %s1053_s12 = inlined_call_operand.hbm [shape: f32[2,32], index: 12, kind: output, shape index: {2}]   ;;  %s1054_s1 = inlined_call_operand.vmem [shape: s32[1,3], index: 1, kind: input, shape index: {}]  }
   0x1   :  { %s585_s23 = scalar_lea.hbm %s1042_s0, 16 }
   0x2   :  { %p586_p0 = scmp.ne.s32.totalorder %s1042_s0, %s585_s23  ;;  %p589_p1 = scmp.lt.u32.totalorder %s585_s23, %s1042_s0 }
   0x4   :  { %p591_p2 = pnand %p589_p1, %p586_p0 }
   0x6   :  { %594 = shalt.err (!%p591_p2)  }
   0x7   :  { %s799_s28 = smov [#allocation5]   ;;  %s20_s15 = sshll.u32 %s1054_s1, 4  ;;  %s21_s15 = int_to_ptr.vmem [resolvable:$true] %s20_s15 }
   0x8   :  { %19 = dma.hbm_to_smem %s1042_s0, 16, %s799_s28, [#allocation4] }
   0x9   :  { %s595_s16 = scalar_lea.vmem %s21_s15, 16  ;;  %p600_p4 = scmp.lt.s32.totalorder %s21_s15, %s21_s15 }
   0xa   :  { %p596_p3 = scmp.ne.s32.totalorder %s21_s15, %s595_s16  ;;  %p601_p5 = scmp.lt.s32.totalorder %s595_s16, %s595_s16 }
   0xc   :  { %p602_p6 = por %p601_p5, %p600_p4 }
   0xe   :  { %p603_p7 = pnand %p602_p6, %p596_p3 }
  0x10   :  { %606 = shalt.err (!%p603_p7)  }
  0x11   :  { %s800_s17 = smov [#allocation6]  }
  0x12   :  { %23 = dma.vmem_to_smem %s21_s15, 16, %s800_s17, [#allocation4] }
  0x13   :  { %787 = dma.done.wait [#allocation4], 32 }
  0x14   :  { %788 = vsyncadd [#allocation4], 4294967264 }
  0x15   :  { %25 = sfence }
  0x16   :  { %26 = vsyncpa [#allocation8], 0 }
  0x17   :  { %27 = vsyncpa [#allocation11], 0 }
  0x18   :  { %28 = vsyncpa [#allocation14], 0 }
  0x19   :  { %29 = vsyncpa [#allocation9], 0  ;;  %s480_s0 = sld [smem:[#allocation6 + $0x1]] }
  0x1a   :  { %30 = vsyncpa [#allocation18], 0  ;;  %s801_s1 = smov [#allocation10]   ;;  %s802_s19 = smov [#allocation13]  }
  0x1b   :  { %s47_s18 = sshll.u32 %s801_s1, 4  ;;  %s74_s20 = sshll.u32 %s802_s19, 4  ;;  %s48_s18 = int_to_ptr.vmem [resolvable:$true] %s47_s18  ;;  %s75_s20 = int_to_ptr.vmem [resolvable:$true] %s74_s20 }
  0x1c   :  { %s607_s23 = scalar_lea.hbm %s1044_s3, 32 }
  0x1d   :  { %p608_p8 = scmp.ne.s32.totalorder %s1044_s3, %s607_s23  ;;  %p611_p9 = scmp.lt.u32.totalorder %s607_s23, %s1044_s3 }
  0x1f   :  { %p613_p10 = pnand %p611_p9, %p608_p8 }
  0x21   :  { %616 = shalt.err (!%p613_p10)
}
  0x22   :  { %s617_s28 = scalar_lea.vmem %s48_s18, 32  ;;  %p622_p12 = scmp.lt.s32.totalorder %s48_s18, %s48_s18 }
  0x23   :  { %p618_p11 = scmp.ne.s32.totalorder %s48_s18, %s617_s28  ;;  %p623_p13 = scmp.lt.s32.totalorder %s617_s28, %s617_s28 }
  0x25   :  { %p624_p0 = por %p623_p13, %p622_p12 }
  0x27   :  { %p625_p1 = pnand %p624_p0, %p618_p11 }
  0x29   :  { %628 = shalt.err (!%p625_p1)
}
  0x2a   :  { %50 = dma.hbm_to_vmem [thread:$0]  %s1044_s3, 32, %s48_s18, [#allocation11]  }
  0x2b   :  { %s495_s13 = sshll.u32 %s480_s0, 10  ;;  %s803_s14 = smov [#allocation7]  }
  0x2c   :  { %s37_s15 = sshll.u32 %s803_s14, 4  ;;  %s73_s1 = scalar_lea.hbm %s1047_s6, %s495_s13  ;;  %s912_s15 = int_to_ptr.vmem [resolvable:$true] %s37_s15 }
  0x2d   :  { %s629_s19 = scalar_lea.hbm %s73_s1, 1024  ;;  %s631_s23 = scalar_lea.hbm %s1047_s6, 3072 }
  0x2e   :  { %p630_p2 = scmp.ne.s32.totalorder %s73_s1, %s629_s19  ;;  %p632_p3 = scmp.lt.u32.totalorder %s73_s1, %s1047_s6 }
  0x2f   :  { %p633_p4 = scmp.lt.u32.totalorder %s631_s23, %s629_s19  ;;  %p635_p6 = scmp.lt.u32.totalorder %s629_s19, %s73_s1 }
  0x31   :  { %p634_p5 = por %p633_p4, %p632_p3 }
  0x33   :  { %p636_p7 = por %p635_p6, %p634_p5 }
  0x35   :  { %p637_p8 = pnand %p636_p7, %p630_p2 }
  0x37   :  { %640 = shalt.err (!%p637_p8)
}
  0x38   :  { %s641_s3 = scalar_lea.vmem %s75_s20, 1024  ;;  %p646_p10 = scmp.lt.s32.totalorder %s75_s20, %s75_s20 }
  0x39   :  { %p642_p9 = scmp.ne.s32.totalorder %s75_s20, %s641_s3  ;;  %p647_p11 = scmp.lt.s32.totalorder %s641_s3, %s641_s3 }
  0x3b   :  { %p648_p12 = por %p647_p11, %p646_p10 }
  0x3d   :  { %p649_p13 = pnand %p648_p12, %p642_p9 }
  0x3f   :  { %652 = shalt.err (!%p649_p13)
}
  0x40   :  { %s804_s0 = smov 128   ;;  %s805_s18 = smov 8  }
  0x41   :  { %80 = dma.hbm_to_vmem [thread:$0]  %s73_s1, 1024, %s75_s20, [#allocation14], %s804_s0, %s804_s0, %s805_s18  }
  0x42   :  { %s653_s27 = scalar_lea.hbm %s1043_s2, 32 }
  0x43   :  { %p654_p0 = scmp.ne.s32.totalorder %s1043_s2, %s653_s27  ;;  %p657_p1 = scmp.lt.u32.totalorder %s653_s27, %s1043_s2 }
  0x45   :  { %p659_p2 = pnand %p657_p1, %p654_p0 }
  0x47   :  { %662 = shalt.err (!%p659_p2)
}
  0x48   :  { %s663_s14 = scalar_lea.vmem %s912_s15, 32  ;;  %p668_p4 = scmp.lt.s32.totalorder %s912_s15, %s912_s15 }
  0x49   :  { %p664_p3 = scmp.ne.s32.totalorder %s912_s15, %s663_s14  ;;  %p669_p5 = scmp.lt.s32.totalorder %s663_s14, %s663_s14 }
  0x4b   :  { %p670_p6 = por %p669_p5, %p668_p4 }
  0x4d   :  { %p671_p7 = pnand %p670_p6, %p664_p3 }
  0x4f   :  { %674 = shalt.err (!%p671_p7)
}
  0x50   :  { %40 = dma.hbm_to_vmem [thread:$0]  %s1043_s2, 32, %s912_s15, [#allocation8]  }
  0x51   :  { %s95_s17 = sld [smem:[#allocation6]]  ;;  %s806_s1 = smov [#allocation12]  }
  0x52   :  { %s57_s19 = sshll.u32 %s806_s1, 4  ;;  %s807_s21 = smov [#allocation15]   ;;  %s58_s19 = int_to_ptr.vmem [resolvable:$true] %s57_s19 }
  0x53   :  { %s102_s22 = sshll.u32 %s807_s21, 4  ;;  %s675_s25 = scalar_lea.hbm %s1045_s4, 32  ;;  %s103_s22 = int_to_ptr.vmem [resolvable:$true] %s102_s22 }
  0x54   :  { %p676_p8 = scmp.ne.s32.totalorder %s1045_s4, %s675_s25  ;;  %p679_p9 = scmp.lt.u32.totalorder %s675_s25, %s1045_s4 }
  0x56   :  { %p681_p10 = pnand %p679_p9, %p676_p8 }
  0x58   :  { %684 = shalt.err (!%p681_p10)
}
  0x59   :  { %s685_s2 = scalar_lea.vmem %s58_s19, 32  ;;  %p690_p12 = scmp.lt.s32.totalorder %s58_s19, %s58_s19 }
  0x5a   :  { %p686_p11 = scmp.ne.s32.totalorder %s58_s19, %s685_s2  ;;  %p691_p13 = scmp.lt.s32.totalorder %s685_s2, %s685_s2 }
  0x5c   :  { %p692_p0 = por %p691_p13, %p690_p12 }
  0x5e   :  { %p693_p1 = pnand %p692_p0, %p686_p11 }
  0x60   :  { %696 = shalt.err (!%p693_p1)
}
  0x61   :  { %60 = dma.hbm_to_vmem [thread:$0]  %s1045_s4, 32, %s58_s19, [#allocation11]  }
  0x62   :  { %s496_s29 = sshll.u32 %s95_s17, 9  ;;  %s699_s21 = scalar_lea.hbm %s1049_s8, 1536 }
  0x63   :  { %s101_s14 = scalar_lea.hbm %s1049_s8, %s496_s29 }
  0x64   :  { %s697_s20 = scalar_lea.hbm %s101_s14, 512  ;;  %p700_p3 = scmp.lt.u32.totalorder %s101_s14, %s1049_s8 }
  0x65   :  { %p698_p2 = scmp.ne.s32.totalorder %s101_s14, %s697_s20  ;;  %p701_p4 = scmp.lt.u32.totalorder %s699_s21, %s697_s20 }
  0x66   :  { %p703_p6 = scmp.lt.u32.totalorder %s697_s20, %s101_s14 }
  0x67   :  { %p702_p5 = por %p701_p4, %p700_p3 }
  0x69   :  { %p704_p7 = por %p703_p6, %p702_p5 }
  0x6b   :  { %p705_p8 = pnand %p704_p7, %p698_p2 }
  0x6d   :  { %708 = shalt.err (!%p705_p8)
}
  0x6e   :  { %s709_s4 = scalar_lea.vmem %s103_s22, 512  ;;  %p714_p10 = scmp.lt.s32.totalorder %s103_s22, %s103_s22 }
  0x6f   :  { %p710_p9 = scmp.ne.s32.totalorder %s103_s22, %s709_s4  ;;  %p715_p11 = scmp.lt.s32.totalorder %s709_s4, %s709_s4 }
  0x71   :  { %p716_p12 = por %p715_p11, %p714_p10 }
  0x73   :  { %p717_p13 = pnand %p716_p12, %p710_p9 }
  0x75   :  { %720 = shalt.err (!%p717_p13)
}
  0x76   :  { %108 = dma.hbm_to_vmem [thread:$0]  %s101_s14, 512, %s103_s22, [#allocation14], %s804_s0, %s804_s0, %s805_s18  }
  0x77   :  { %789 = dma.done.wait [#allocation8], 32  }
  0x78   :  { %790 = vsyncadd [#allocation8], 4294967264 }
  0x79   :  { %791 = dma.done.wait [#allocation11], 64  }
  0x7a   :  { %792 = vsyncadd [#allocation11], 4294967232 }
  0x7b   :  { %793 = dma.done.wait [#allocation14], 1536  }
  0x7c   :  { %794 = vsyncadd [#allocation14], 4294965760  ;;  %s485_s8 = sld [smem:[#allocation6 + $0x1]]  ;;  %s159_s17 = sld [smem:[#allocation6]]  ;;  %vm177_vm0 = vcmask 254976   ;;  %vm174_vm1 = vcmask 517376  }
  0x7d   :  { %s486_s19 = sld [smem:[#allocation6 + $0x2]]  ;;  %v176_v0 = vld [vmem:[#allocation12] sm:$0x3]  ;;  %v169_v1 = vld [vmem:[#allocation10] sm:$0x3]  ;;  %s808_s25 = smov 32  }
  0x7e   :  { %178 = vst.msk [vmem:[#allocation3] sm:$0x3] %vm177_vm0, %v176_v0  ;;  %171 = vrot.lane.b32.xlu0 %v169_v1, %s808_s25 }
  0x82   :  { %p150_p0 = scmp.lt.s32.totalorder %s485_s8, 2  ;;  %p160_p1 = scmp.lt.s32.totalorder %s159_s17, 2 }
  0x83   :  { %p487_p2 = scmp.ne.s32.totalorder %s486_s19, 0 }
  0x84   :  { %s1056_s8 = smov (!%p150_p0, %s485_s8), 2  ;;  %s1058_s17 = smov (!%p160_p1, %s159_s17), 2 }
  0x85   :  { %s152_s22 = scalar_lea.vmem %s1048_s7, %s1056_s8  ;;  %s162_s26 = scalar_lea.vmem %s1050_s9, %s1058_s17  ;;  %v186_v3 = vld [vmem:[#allocation7] sm:$0x3] (!%p487_p2) }
  0xeb   :  { %185 = sbr.rel (%p487_p2) target bundleno = 243 (0xf3), region = 61 }
  0xf0   :  { %v172_v2 = vpop.permute.xlu0 %171 }
  0xf1   :  { %175 = vst.msk [vmem:[#allocation2] sm:$0x3] %vm174_vm1, %v172_v2 }
  0xf2   :  { %188 = vst.msk [vmem:[#allocation2] sm:$0x3] %vm177_vm0, %v186_v3 }
  0xf3 PF:  { %p488_p3 = scmp.ne.s32.totalorder %s486_s19, 1 }
  0xf4   :  { %s193_s27 = sld [smem:[#allocation5]] (!%p488_p3)  ;;  %s489_s2 = sld [smem:[#allocation5 + $0x1]] (!%p488_p3)  ;;  %vm196_vm2 = vcmask (!%p488_p3), 253952  }
  0xf5   :  { %192 = sbr.rel (%p488_p3) target bundleno = 254 (0xfe), region = 65 }
  0xfa   :  { %s194_s29 = scalar_lea.vmem (!%p488_p3), %s1046_s5, %s193_s27  ;;  %s200_s14 = scalar_lea.vmem (!%p488_p3), %s1046_s5, %s489_s2 }
  0xfb   :  { %v195_v4 = vld [vmem:[%s194_s29] sm:$0x1] (!%p488_p3) }
  0xfc   :  { %v201_v5 = vld [vmem:[%s200_s14] sm:$0x1]  ;;  %197 = vst.msk [vmem:[#allocation2] sm:$0x1] %vm196_vm2, %v195_v4 }
  0xfd   :  { %202 = vst.msk [vmem:[#allocation2 + $0x1] sm:$0x1] %vm196_vm2, %v201_v5 }
  0xfe PF:  { %v204_v6 = vld [vmem:[#allocation13] sm:$0xff]  ;;  %v205_v7 = vld [vmem:[#allocation13 + $0x8] sm:$0xff]  ;;  %v206_v8 = vld [vmem:[#allocation13 + $0x10] sm:$0xff]  ;;  %v809_v9 = vmov 0.0|0.0   ;;  %vm810_vm3 = vmmov 0   ;;  %v811_v12 = vmov 0.0  }
  0xff   :  { %541 = vmatprep.subr.bf16.mxu0 %v809_v9  ;;  %v542_v10 = vpack.c.bf16 %v205_v7, %v204_v6  ;;  %v207_v11 = vld [vmem:[#allocation13 + $0x18] sm:$0xff]  ;;  %527 = vmatprep.mubr.msk.f32.mxu0 %vm810_vm3, %v811_v12  ;;  %v208_v14 = vld [vmem:[#allocation13 + $0x20] sm:$0xff]  ;;  %v209_v15 = vld [vmem:[#allocation13 + $0x28] sm:$0xff]  ;;  %vm219_vm4 = vcmask 523264   ;;  %s812_s16 = smov 64   ;;  %s813_s7 = smov 96  }
 0x100   :  { %553 = vmatprep.subr.bf16.mxu1 %v809_v9  ;;  %538 = vmatprep.mubr.msk.f32.mxu1 %vm810_vm3, %v811_v12  ;;  %v545_v13 = vpack.c.bf16 %v207_v11, %v206_v8  ;;  %v548_v16 = vpack.c.bf16 %v209_v15, %v208_v14  ;;  %v210_v17 = vld [vmem:[#allocation13 + $0x30] sm:$0xff]  ;;  %v211_v18 = vld [vmem:[#allocation13 + $0x38] sm:$0xff]  ;;  %v334_v37 = vld [vmem:[#allocation15] sm:$0xff]  ;;  %vm347_vm5 = vcmask 261120   ;;  %s814_s1 = smov [#allocation17]  }
 0x101   :  { %543 = vmatpush3.bf16.msra.mxu0 %v542_v10  ;;  %v551_v19 = vpack.c.bf16 %v211_v18, %v210_v17  ;;  %v490_v21 = vld [vmem:[%s152_s22] ss:$0 sm:$0xff]  ;;  %v300_v26 = vld [vmem:[#allocation3] sm:$0x3]  ;;  %v335_v38 = vld [vmem:[#allocation15 + $0x8] sm:$0xff]  ;;  %s440_s21 = sshll.u32 %s814_s1, 4  ;;  %s441_s21 = int_to_ptr.vmem [resolvable:$true] %s440_s21 }
 0x102   :  { %544 = vmatprep.subr.bf16.mxu0 %v809_v9  ;;  %v336_v39 = vld [vmem:[#allocation15 + $0x10] sm:$0xff]  ;;  %v554_v40 = vpack.c.bf16 %v335_v38, %v334_v37  ;;  %v337_v41 = vld [vmem:[#allocation15 + $0x18] sm:$0xff]  ;;  %s721_s23 = scalar_lea.vmem %s441_s21, 32  ;;  %p726_p5 = scmp.lt.s32.totalorder %s441_s21, %s441_s21 }
 0x103   :  { %v557_v42 = vpack.c.bf16 %v337_v41, %v336_v39  ;;  %p722_p4 = scmp.ne.s32.totalorder %s441_s21, %s721_s23  ;;  %p727_p6 = scmp.lt.s32.totalorder %s721_s23, %s721_s23 }
 0x104   :  { %v203_v20 = vld [vmem:[#allocation2] sm:$0x3]  ;;  %555 = vmatpush3.bf16.msra.mxu1 %v554_v40 }
 0x105   :  { %546 = vmatpush3.bf16.msra.mxu0 %v545_v13  ;;  %556 = vmatprep.subr.bf16.mxu1 %v809_v9  ;;  %p728_p7 = por %p727_p6, %p726_p5 }
 0x106   :  { %547 = vmatprep.subr.bf16.mxu0 %v809_v9 }
 0x107   :  { %p729_p8 = pnand %p728_p7, %p722_p4 }
 0x108   :  { %558 = vmatpush3.bf16.msra.mxu1 %v557_v42 }
 0x109   :  { %549 = vmatpush3.bf16.msra.mxu0 %v548_v16 }
 0x10a   :  { %550 = vmatprep.subr.bf16.mxu0 %v809_v9 }
 0x10d   :  { %552 = vmatpush3.bf16.msra.mxu0 %v551_v19 }
 0x110   :  { %528 = vmatmul.mubr.msk.f32.vlgmr.msra.gmra.mrb[0].mxu0 %vm219_vm4, %v203_v20 }
 0x1e3   :  { %v289_v22 = vpop.f32.mrb[0].mxu0 }
 0x1e4   :  { %v290_v23 = vadd.f32 %v490_v21, %v289_v22  ;;  %v529_v24 = vpop.f32.mrb[1].mxu0 }
 0x1e6   :  { %577 = vtanh.f32 %v290_v23  ;;  %v492_v27 = vmul.f32 -1.442695, %v290_v23 }
 0x1e8   :  { %579 = vpow2.f32 %v492_v27 }
 0x1f0   :  { %v578_v25 = vpop.eup %577 }
 0x1f1   :  { %307 = vrot.lane.b32.xlu0 %v578_v25, %s812_s16 }
 0x1f2   :  { %v580_v28 = vpop.eup %579 }
 0x1f3   :  { %v296_v29 = vadd.f32 1.0, %v580_v28 }
 0x1f5   :  { %302 = vrot.lane.b32.xlu0 %v300_v26, %s808_s25  ;;  %581 = vrcp.f32 %v296_v29 }
 0x1ff   :  { %v582_v30 = vpop.eup %581 }
 0x263   :  { %v308_v31 = vpop.permute.xlu0 %307 }
 0x264   :  { %v310_v32 = vmul.f32 %v582_v30, %v308_v31 }
 0x266   :  { %312 = vrot.lane.b32.xlu1 %v310_v32, %s808_s25 }
 0x267   :  { %v303_v33 = vpop.permute.xlu0 %302 }
 0x268   :  { %v305_v34 = vmul.f32 %v582_v30, %v303_v33 }
 0x2d8   :  { %v313_v35 = vpop.permute.xlu1 %312 }
 0x2d9   :  { %v315_v36 = vadd.f32 %v313_v35, %v305_v34 }
 0x2db   :  { %583 = vtanh.f32 %v315_v36 }
 0x2e5   :  { %v584_v43 = vpop.eup %583 }
 0x2e6   :  { %318 = vrot.lane.b32.xlu1 %v584_v43, %s812_s16 }
 0x2ea   :  { %323 = vrot.lane.b32.xlu1 %v315_v36, %s813_s7 }
 0x358   :  { %v319_v44 = vpop.permute.xlu1 %318 }
 0x359   :  { %v321_v45 = vmul.f32 %v582_v30, %v319_v44 }
 0x35b   :  { %345 = vrot.lane.b32.xlu0 %v321_v45, %s808_s25 }
 0x35c   :  { %v324_v46 = vpop.permute.xlu1 %323 }
 0x35d   :  { %327 = vst.msk [vmem:[#allocation3] sm:$0x3] %vm177_vm0, %v324_v46  ;;  %423 = vst.msk [vmem:[#allocation19] sm:$0x3] %vm177_vm0, %v324_v46 }
 0x35f   :  { %329 = vrot.lane.b32.xlu0 %v321_v45, %s812_s16 }
 0x3cd   :  { %v346_v47 = vpop.permute.xlu0 %345 }
 0x3ce   :  { %422 = vst.msk [vmem:[#allocation17] sm:$0x3] %vm177_vm0, %v346_v47  ;;  %539 = vmatmul.mubr.msk.f32.vlgmr.msra.gmra.mrb[0].mxu1 %vm347_vm5, %v346_v47 }
 0x3d1   :  { %v330_v48 = vpop.permute.xlu0 %329 }
 0x3d2   :  { %333 = vst.msk [vmem:[#allocation2] sm:$0x3] %vm174_vm1, %v330_v48 }
 0x3d3   :  { %732 = shalt.err (!%p729_p8)
}
 0x3d4   :  { %s733_s8 = scalar_lea.hbm %s1052_s11, 32 }
 0x3d5   :  { %p734_p9 = scmp.ne.s32.totalorder %s1052_s11, %s733_s8  ;;  %p737_p10 = scmp.lt.u32.totalorder %s733_s8, %s1052_s11 }
 0x3d7   :  { %p739_p11 = pnand %p737_p10, %p734_p9 }
 0x3d9   :  { %742 = shalt.err (!%p739_p11)
}
 0x3da   :  { %443 = dma.vmem_to_hbm [thread:$0]  %s441_s21, 32, %s1052_s11, [#allocation18]  }
 0x3db   :  { %s815_s6 = smov [#allocation19]  }
 0x3dc   :  { %s450_s27 = sshll.u32 %s815_s6, 4  ;;  %s451_s27 = int_to_ptr.vmem [resolvable:$true] %s450_s27 }
 0x3dd   :  { %s743_s2 = scalar_lea.vmem %s451_s27, 32  ;;  %p748_p13 = scmp.lt.s32.totalorder %s451_s27, %s451_s27 }
 0x3de   :  { %p744_p12 = scmp.ne.s32.totalorder %s451_s27, %s743_s2  ;;  %p749_p0 = scmp.lt.s32.totalorder %s743_s2, %s743_s2 }
 0x3e0   :  { %p750_p1 = por %p749_p0, %p748_p13 }
 0x3e2   :  { %p751_p2 = pnand %p750_p1, %p744_p12 }
 0x3e4   :  { %754 = shalt.err (!%p751_p2)
}
 0x3e5   :  { %s755_s29 = scalar_lea.hbm %s1053_s12, 32 }
 0x3e6   :  { %p756_p3 = scmp.ne.s32.totalorder %s1053_s12, %s755_s29  ;;  %p759_p4 = scmp.lt.u32.totalorder %s755_s29, %s1053_s12 }
 0x3e8   :  { %p761_p5 = pnand %p759_p4, %p756_p3 }
 0x3ea   :  { %764 = shalt.err (!%p761_p5)
}
 0x3eb   :  { %453 = dma.vmem_to_hbm [thread:$0]  %s451_s27, 32, %s1053_s12, [#allocation18]   ;;  %v493_v49 = vld [vmem:[%s162_s26] ss:$0 sm:$0xff] }
 0x3ec   :  { %s816_s1 = smov [#allocation16]  }
 0x3ed   :  { %s430_s21 = sshll.u32 %s816_s1, 4  ;;  %s431_s21 = int_to_ptr.vmem [resolvable:$true] %s430_s21 }
 0x3ee   :  { %s765_s23 = scalar_lea.vmem %s431_s21, 32  ;;  %p770_p7 = scmp.lt.s32.totalorder %s431_s21, %s431_s21 }
 0x3ef   :  { %p766_p6 = scmp.ne.s32.totalorder %s431_s21, %s765_s23  ;;  %p771_p8 = scmp.lt.s32.totalorder %s765_s23, %s765_s23 }
 0x3f1   :  { %p772_p9 = por %p771_p8, %p770_p7 }
 0x3f3   :  { %p773_p10 = pnand %p772_p9, %p766_p6 }
 0x4a1   :  { %v416_v50 = vpop.f32.mrb[0].mxu1 }
 0x4a2   :  { %v417_v51 = vadd.f32 %v493_v49, %v416_v50  ;;  %v540_v52 = vpop.f32.mrb[1].mxu1 }
 0x4a4   :  { %420 = vst [vmem:[#allocation16] sm:$0x3] %v417_v51 }
 0x4a5   :  { %776 = shalt.err (!%p773_p10)
}
 0x4a6   :  { %s777_s4 = scalar_lea.hbm %s1051_s10, 32 }
 0x4a7   :  { %p778_p11 = scmp.ne.s32.totalorder %s1051_s10, %s777_s4  ;;  %p781_p12 = scmp.lt.u32.totalorder %s777_s4, %s1051_s10 }
 0x4a9   :  { %p783_p13 = pnand %p781_p12, %p778_p11 }
 0x4ab   :  { %786 = shalt.err (!%p783_p13)
}
 0x4ac   :  { %433 = dma.vmem_to_hbm [thread:$0]  %s431_s21, 32, %s1051_s10, [#allocation9]  }
 0x4ad   :  { %795 = dma.done.wait [#allocation9], 32  }
 0x4ae   :  { %796 = vsyncadd [#allocation9], 4294967264 }
 0x4af   :  { %797 = dma.done.wait [#allocation18], 64  }
 0x4b0   :  { %798 = vsyncadd [#allocation18], 4294967232 }
 0x4b1   :  { %463 = vsyncpa [#allocation8], 1 }
 0x4b2   :  { %464 = vsyncpa [#allocation11], 1 }
 0x4b3   :  { %465 = vsyncpa [#allocation14], 1 }
 0x4b4   :  { %466 = vsyncpa [#allocation9], 1 }
 0x4b5   :  { %467 = vsyncpa [#allocation18], 1 }

</bundles_post_ra>
